<compile_context>
chip_gen: v6e
topology: v6e:2x2x1
jax: 0.10.0
libtpu: 0.0.40
codegen_flags: <defaults>
</compile_context>

<pallas_src>
import functools

import jax
import jax.numpy as jnp
from jax.experimental import pallas as pl
from jax.experimental.pallas import tpu as pltpu

BN_EPS = 1e-5
_HIGHEST = jax.lax.Precision.HIGHEST
_DEFAULT_BATCH_TILE = 512   # 512-2048 rows ~ HBM roofline; tiny vs VMEM limits.


def _round_up(x, m):
    return (x + m - 1) // m * m


# ---------------------------------------------------------------------------
# Shared output projection: h -> exp(h @ W2 + b2).
# ---------------------------------------------------------------------------
def _project_out(h, w2_ref, b2_ref, out_ref, lane_dense_out):
    if lane_dense_out:
        # n_output == 1: contract the hidden axis as (1,H) x (TB,H)^T -> (1,TB)
        # so the result lands lane-dense (batch on lanes) and the store is a
        # full unmasked vst; b2 is a single SMEM scalar.
        o = jax.lax.dot_general(w2_ref[...], h, (((1,), (1,)), ((), ())),
                                preferred_element_type=jnp.float32,
                                precision=_HIGHEST)
        out_ref[...] = jnp.exp(o + b2_ref[0, 0])
    else:
        o = jnp.dot(h, w2_ref[...], preferred_element_type=jnp.float32,
                    precision=_HIGHEST)
        out_ref[...] = jnp.exp(o + b2_ref[...])


def _hidden(x_ref, w1_ref, b1_ref):
    h = jnp.dot(x_ref[...], w1_ref[...], preferred_element_type=jnp.float32,
                precision=_HIGHEST)
    return jnp.maximum(h + b1_ref[...], 0.0)


# ---------------------------------------------------------------------------
# Fused single-tile kernel (batch_norm=True, whole batch fits in one tile).
# ---------------------------------------------------------------------------
def _fused_bn_kernel(x_ref, w1_ref, b1_ref, w2_ref, b2_ref, gamma_ref,
                     beta_ref, out_ref, *, n_rows, lane_dense_out):
    h = _hidden(x_ref, w1_ref, b1_ref)
    if h.shape[0] != n_rows:
        # Zero-out batch-padding rows so they do not pollute the statistics.
        row = jax.lax.broadcasted_iota(jnp.int32, h.shape, 0)
        h_stat = jnp.where(row < n_rows, h, 0.0)
    else:
        h_stat = h
    inv_n = jnp.float32(1.0 / n_rows)
    mean = jnp.sum(h_stat, axis=0, keepdims=True) * inv_n
    var = jnp.maximum(
        jnp.sum(h_stat * h_stat, axis=0, keepdims=True) * inv_n - mean * mean,
        0.0)                                               # biased batch var
    scale = gamma_ref[...] * jax.lax.rsqrt(var + BN_EPS)   # fold BN affine
    shift = beta_ref[...] - mean * scale
    _project_out(h * scale + shift, w2_ref, b2_ref, out_ref, lane_dense_out)


# ---------------------------------------------------------------------------
# Multi-tile pass 1 (batch_norm=True): accumulate batch statistics of h.
# ---------------------------------------------------------------------------
def _stats_kernel(x_ref, w1_ref, b1_ref, sum_ref, sumsq_ref, *, tb, n_rows,
                  mask_rows):
    @pl.when(pl.program_id(0) == 0)
    def _():
        sum_ref[...] = jnp.zeros_like(sum_ref)
        sumsq_ref[...] = jnp.zeros_like(sumsq_ref)

    h = _hidden(x_ref, w1_ref, b1_ref)
    if mask_rows:
        row = pl.program_id(0) * tb + jax.lax.broadcasted_iota(
            jnp.int32, h.shape, 0)
        h = jnp.where(row < n_rows, h, 0.0)
    sum_ref[...] += jnp.sum(h, axis=0, keepdims=True)
    sumsq_ref[...] += jnp.sum(h * h, axis=0, keepdims=True)


def _batch_stats(x_pad, w1, b1, *, tb, n_rows, num_tiles):
    n_input = x_pad.shape[1]
    n_hidden = w1.shape[1]
    kernel = functools.partial(
        _stats_kernel, tb=tb, n_rows=n_rows,
        mask_rows=(x_pad.shape[0] != n_rows))
    return pl.pallas_call(
        kernel,
        out_shape=(jax.ShapeDtypeStruct((1, n_hidden), jnp.float32),
                   jax.ShapeDtypeStruct((1, n_hidden), jnp.float32)),
        grid=(num_tiles,),
        in_specs=[
            pl.BlockSpec((tb, n_input), lambda i: (i, 0)),
            pl.BlockSpec((n_input, n_hidden), lambda i: (0, 0)),   # resident
            pl.BlockSpec((1, n_hidden), lambda i: (0, 0)),         # resident
        ],
        out_specs=(pl.BlockSpec((1, n_hidden), lambda i: (0, 0)),
                   pl.BlockSpec((1, n_hidden), lambda i: (0, 0))),
        compiler_params=pltpu.CompilerParams(
            dimension_semantics=("arbitrary",)),   # accumulators across tiles
    )(x_pad, w1, b1)


# ---------------------------------------------------------------------------
# Pass 2 / no-BN forward: hidden (+ folded BN affine) + projection + exp.
# ---------------------------------------------------------------------------
def _fwd_kernel_bn(x_ref, w1_ref, b1_ref, w2_ref, b2_ref, scale_ref, shift_ref,
                   out_ref, *, lane_dense_out):
    h = _hidden(x_ref, w1_ref, b1_ref)
    _project_out(h * scale_ref[...] + shift_ref[...], w2_ref, b2_ref, out_ref,
                 lane_dense_out)


def _fwd_kernel(x_ref, w1_ref, b1_ref, w2_ref, b2_ref, out_ref, *,
                lane_dense_out):
    _project_out(_hidden(x_ref, w1_ref, b1_ref), w2_ref, b2_ref, out_ref,
                 lane_dense_out)


# ---------------------------------------------------------------------------
# Wrapper.
# ---------------------------------------------------------------------------
def loglink_forward(x, w1, b1, w2, b2, gamma=None, beta=None, *,
                    batch_norm=True, batch_tile=_DEFAULT_BATCH_TILE):
    """x: (B, n_input) f32 -> (B, n_output) f32.

    Weights are stored transposed vs PyTorch: w1:(n_input,n_hidden),
    w2:(n_hidden,n_output), b1:(1,n_hidden), b2:(1,n_output).
    NOTE: like the kernel it mirrors, BN with batch size 1 normalizes with
    var=0 (PyTorch raises in that case).
    """
    B, n_input = x.shape
    n_hidden = w1.shape[1]
    n_output = w2.shape[1]

    # Batch tiling: biggest tile up to batch_tile, (8,128)-legal, pad batch.
    tb = min(batch_tile, _round_up(B, 8))
    b_pad = _round_up(B, tb)
    num_tiles = b_pad // tb
    x_pad = x if b_pad == B else jnp.pad(x, ((0, b_pad - B), (0, 0)))

    fuse_bn = batch_norm and num_tiles == 1
    if batch_norm and not fuse_bn:
        h_sum, h_sumsq = _batch_stats(x_pad, w1, b1, tb=tb, n_rows=B,
                                      num_tiles=num_tiles)
        mean = h_sum / B
        var = jnp.maximum(h_sumsq / B - mean * mean, 0.0)  # biased batch var
        scale = gamma * jax.lax.rsqrt(var + BN_EPS)        # fold BN affine
        shift = beta - mean * scale

    lane_dense = (n_output == 1)
    x_spec = pl.BlockSpec((tb, n_input), lambda i: (i, 0))
    w1_spec = pl.BlockSpec((n_input, n_hidden), lambda i: (0, 0))
    row_spec = pl.BlockSpec((1, n_hidden), lambda i: (0, 0))

    in_specs = [x_spec, w1_spec, row_spec]
    args = [x_pad, w1, b1]
    if lane_dense:
        in_specs += [row_spec,                                     # W2 as row
                     pl.BlockSpec(memory_space=pltpu.MemorySpace.SMEM)]  # b2
        args += [w2.reshape(1, n_hidden), b2.reshape(1, 1)]
        out_shape = jax.ShapeDtypeStruct((1, b_pad), jnp.float32)
        out_spec = pl.BlockSpec((1, tb), lambda i: (0, i))
    else:
        in_specs += [pl.BlockSpec((n_hidden, n_output), lambda i: (0, 0)),
                     pl.BlockSpec((1, n_output), lambda i: (0, 0))]
        args += [w2, b2.reshape(1, n_output)]
        out_shape = jax.ShapeDtypeStruct((b_pad, n_output), jnp.float32)
        out_spec = pl.BlockSpec((tb, n_output), lambda i: (i, 0))

    if fuse_bn:
        kernel = functools.partial(_fused_bn_kernel, n_rows=B,
                                   lane_dense_out=lane_dense)
        in_specs += [row_spec, row_spec]
        args += [gamma.reshape(1, n_hidden), beta.reshape(1, n_hidden)]
        semantics = ("arbitrary",)            # single step; nothing to shard
    elif batch_norm:
        kernel = functools.partial(_fwd_kernel_bn, lane_dense_out=lane_dense)
        in_specs += [row_spec, row_spec]
        args += [scale, shift]
        semantics = ("parallel",)             # independent tiles
    else:
        kernel = functools.partial(_fwd_kernel, lane_dense_out=lane_dense)
        semantics = ("parallel",)

    out = pl.pallas_call(
        kernel,
        out_shape=out_shape,
        grid=(num_tiles,),
        in_specs=in_specs,
        out_specs=out_spec,
        # Default scoped VMEM is ample for these tiny tiles -> no vmem override.
        compiler_params=pltpu.CompilerParams(dimension_semantics=semantics),
    )(*args)

    if lane_dense:
        return out[0, :B].reshape(B, 1)
    return out[:B]


# ---------------------------------------------------------------------------
# Parameter init mirroring the module's __init__, and a pure-JAX reference.
# ---------------------------------------------------------------------------
def init_params(key, n_input, n_hidden, n_output, init_bias):
    """hidden: default PyTorch Linear init; linear: weight=0, bias=init_bias;
    batchnorm: gamma=1, beta=0."""
    k1, k2 = jax.random.split(key)
    bound = 1.0 / jnp.sqrt(jnp.float32(n_input))
    w1 = jax.random.uniform(k1, (n_input, n_hidden), jnp.float32, -bound, bound)
    b1 = jax.random.uniform(k2, (1, n_hidden), jnp.float32, -bound, bound)
    w2 = jnp.zeros((n_hidden, n_output), jnp.float32)        # nn.init.zeros_
    b2 = jnp.full((1, n_output), init_bias, jnp.float32)     # bias = init_bias
    gamma = jnp.ones((1, n_hidden), jnp.float32)
    beta = jnp.zeros((1, n_hidden), jnp.float32)
    return w1, b1, w2, b2, gamma, beta


def reference_forward(x, w1, b1, w2, b2, gamma=None, beta=None, batch_norm=True):
    hp = jax.lax.Precision.HIGHEST
    h = jnp.maximum(jnp.dot(x, w1, precision=hp) + b1, 0.0)
    if batch_norm:
        mean = jnp.mean(h, axis=0, keepdims=True)
        var = jnp.mean((h - mean) ** 2, axis=0, keepdims=True)
        h = (h - mean) / jnp.sqrt(var + BN_EPS) * gamma + beta
    return jnp.exp(jnp.dot(h, w2, precision=hp) + b2)


if __name__ == "__main__":
    def check(out, ref):
        assert out.shape == ref.shape, (out.shape, ref.shape)
        assert bool(jnp.all(jnp.isfinite(out)))
        assert jnp.allclose(out, ref, rtol=3e-3, atol=1e-5), \
            float(jnp.max(jnp.abs(out - ref)))

    key = jax.random.PRNGKey(0)
    kx, kp, kw, kb, kg, kbt, kx2 = jax.random.split(key, 7)

    # Shapes implied by the module defaults: n_input=8, n_output=1.
    B, n_input, n_hidden, n_output = 8, 8, 32, 1
    init_bias = 0.1
    x = jax.random.normal(kx, (B, n_input), jnp.float32)

    # 1) Module-faithful init (W2 = 0 -> out == exp(init_bias)), BN on (fused).
    params = init_params(kp, n_input, n_hidden, n_output, init_bias)
    out = jax.block_until_ready(loglink_forward(x, *params, batch_norm=True))
    check(out, reference_forward(x, *params, batch_norm=True))

    # 2) Random parameters so the BN + log-link math is actually exercised.
    w1, b1 = params[0], params[1]
    w2 = 0.2 * jax.random.normal(kw, (n_hidden, n_output), jnp.float32)
    b2 = 0.1 * jax.random.normal(kb, (1, n_output), jnp.float32)
    gamma = 1.0 + 0.1 * jax.random.normal(kg, (1, n_hidden), jnp.float32)
    beta = 0.1 * jax.random.normal(kbt, (1, n_hidden), jnp.float32)
    rp = (w1, b1, w2, b2, gamma, beta)
    out = jax.block_until_ready(loglink_forward(x, *rp, batch_norm=True))
    check(out, reference_forward(x, *rp, batch_norm=True))

    # 3) batch_norm=False path (gamma/beta never passed to the kernel).
    out = jax.block_until_ready(
        loglink_forward(x, w1, b1, w2, b2, batch_norm=False))
    check(out, reference_forward(x, w1, b1, w2, b2, batch_norm=False))

    # 4) Multi-tile batch: exercises the two-pass BN with padded/masked rows.
    B2 = 600                       # -> 2 tiles of 512 rows, padding masked
    x2 = jax.random.normal(kx2, (B2, n_input), jnp.float32)
    out = jax.block_until_ready(loglink_forward(x2, *rp, batch_norm=True))
    check(out, reference_forward(x2, *rp, batch_norm=True))

    # 5) Non-fused small-batch with padding (B not a multiple of 8), fused BN.
    x3 = jax.random.normal(kx2, (5, n_input), jnp.float32)
    out = jax.block_until_ready(loglink_forward(x3, *rp, batch_norm=True))
    check(out, reference_forward(x3, *rp, batch_norm=True))

    # 6) n_output > 1 uses the general (TB, n_output) output path.
    w2m = 0.2 * jax.random.normal(kw, (n_hidden, 4), jnp.float32)
    b2m = jnp.zeros((1, 4), jnp.float32)
    out = jax.block_until_ready(
        loglink_forward(x, w1, b1, w2m, b2m, gamma, beta, batch_norm=True))
    check(out, reference_forward(x, w1, b1, w2m, b2m, gamma, beta,
                                 batch_norm=True))

    print("KERNEL_OK")
</pallas_src>

<mosaic_0001>
module attributes {stable_mosaic.version = 11 : i64} {
  func.func @_fused_bn_kernel(%arg0: i32, %arg1: memref<8x8xf32, #tpu.memory_space<vmem>>, %arg2: memref<8x32xf32, #tpu.memory_space<vmem>>, %arg3: memref<1x32xf32, #tpu.memory_space<vmem>>, %arg4: memref<1x32xf32, #tpu.memory_space<vmem>>, %arg5: memref<1x1xf32, #tpu.memory_space<smem>>, %arg6: memref<1x32xf32, #tpu.memory_space<vmem>>, %arg7: memref<1x32xf32, #tpu.memory_space<vmem>>, %arg8: memref<1x8xf32, #tpu.memory_space<vmem>>) attributes {dimension_semantics = [#tpu.dimension_semantics<arbitrary>], iteration_bounds = array<i64: 1>, scalar_prefetch = 0 : i64, scratch_operands = 0 : i64, tpu.core_type = #tpu.core_type<tc>, window_params = [{transform_indices = @transform_0, window_bounds = array<i64: 8, 8>}, {pipeline_mode = #tpu.pipeline_mode<synchronous>, transform_indices = @transform_1, window_bounds = array<i64: 8, 32>}, {pipeline_mode = #tpu.pipeline_mode<synchronous>, transform_indices = @transform_2, window_bounds = array<i64: 1, 32>}, {pipeline_mode = #tpu.pipeline_mode<synchronous>, transform_indices = @transform_3, window_bounds = array<i64: 1, 32>}, {transform_indices = @transform_4, window_bounds = array<i64: 1, 1>}, {pipeline_mode = #tpu.pipeline_mode<synchronous>, transform_indices = @transform_5, window_bounds = array<i64: 1, 32>}, {pipeline_mode = #tpu.pipeline_mode<synchronous>, transform_indices = @transform_6, window_bounds = array<i64: 1, 32>}, {transform_indices = @transform_7, window_bounds = array<i64: 1, 8>}]} {
    %c0 = arith.constant 0 : index
    %c0_0 = arith.constant 0 : index
    %0 = vector.load %arg1[%c0, %c0_0] : memref<8x8xf32, #tpu.memory_space<vmem>>, vector<8x8xf32>
    %c0_1 = arith.constant 0 : index
    %c0_2 = arith.constant 0 : index
    %1 = vector.load %arg2[%c0_1, %c0_2] : memref<8x32xf32, #tpu.memory_space<vmem>>, vector<8x32xf32>
    %cst = arith.constant dense<0.000000e+00> : vector<8x32xf32>
    %2 = tpu.matmul %0, %1, %cst {dimension_numbers = #tpu.dot_dimension_numbers<[1], [0], [0], [1], [0, 0, 1, 1], [], []>, precision = #tpu.contract_precision<fp32>} : vector<8x8xf32>, vector<8x32xf32>, vector<8x32xf32> -> vector<8x32xf32>
    %c0_3 = arith.constant 0 : index
    %c0_4 = arith.constant 0 : index
    %3 = vector.load %arg3[%c0_3, %c0_4] : memref<1x32xf32, #tpu.memory_space<vmem>>, vector<1x32xf32>
    %4 = vector.broadcast %3 : vector<1x32xf32> to vector<8x32xf32>
    %5 = arith.addf %2, %4 : vector<8x32xf32>
    %cst_5 = arith.constant 0.000000e+00 : f32
    %6 = vector.broadcast %cst_5 : f32 to vector<8x32xf32>
    %7 = arith.maximumf %5, %6 : vector<8x32xf32>
    %cst_6 = arith.constant dense<0.000000e+00> : vector<32xf32>
    %8 = vector.multi_reduction <add>, %7, %cst_6 [0] : vector<8x32xf32> to vector<32xf32>
    %9 = vector.shape_cast %8 : vector<32xf32> to vector<1x32xf32>
    %cst_7 = arith.constant 1.250000e-01 : f32
    %10 = vector.broadcast %cst_7 : f32 to vector<1x32xf32>
    %11 = arith.mulf %9, %10 : vector<1x32xf32>
    %12 = arith.mulf %7, %7 : vector<8x32xf32>
    %cst_8 = arith.constant dense<0.000000e+00> : vector<32xf32>
    %13 = vector.multi_reduction <add>, %12, %cst_8 [0] : vector<8x32xf32> to vector<32xf32>
    %14 = vector.shape_cast %13 : vector<32xf32> to vector<1x32xf32>
    %cst_9 = arith.constant 1.250000e-01 : f32
    %15 = vector.broadcast %cst_9 : f32 to vector<1x32xf32>
    %16 = arith.mulf %14, %15 : vector<1x32xf32>
    %17 = arith.mulf %11, %11 : vector<1x32xf32>
    %18 = arith.subf %16, %17 : vector<1x32xf32>
    %cst_10 = arith.constant 0.000000e+00 : f32
    %19 = vector.broadcast %cst_10 : f32 to vector<1x32xf32>
    %20 = arith.maximumf %18, %19 : vector<1x32xf32>
    %c0_11 = arith.constant 0 : index
    %c0_12 = arith.constant 0 : index
    %21 = vector.load %arg6[%c0_11, %c0_12] : memref<1x32xf32, #tpu.memory_space<vmem>>, vector<1x32xf32>
    %cst_13 = arith.constant 9.99999974E-6 : f32
    %22 = vector.broadcast %cst_13 : f32 to vector<1x32xf32>
    %23 = arith.addf %20, %22 : vector<1x32xf32>
    %24 = math.rsqrt %23 : vector<1x32xf32>
    %25 = arith.mulf %21, %24 : vector<1x32xf32>
    %c0_14 = arith.constant 0 : index
    %c0_15 = arith.constant 0 : index
    %26 = vector.load %arg7[%c0_14, %c0_15] : memref<1x32xf32, #tpu.memory_space<vmem>>, vector<1x32xf32>
    %27 = arith.mulf %11, %25 : vector<1x32xf32>
    %28 = arith.subf %26, %27 : vector<1x32xf32>
    %29 = vector.broadcast %25 : vector<1x32xf32> to vector<8x32xf32>
    %30 = arith.mulf %7, %29 : vector<8x32xf32>
    %31 = vector.broadcast %28 : vector<1x32xf32> to vector<8x32xf32>
    %32 = arith.addf %30, %31 : vector<8x32xf32>
    %c0_16 = arith.constant 0 : index
    %c0_17 = arith.constant 0 : index
    %33 = vector.load %arg4[%c0_16, %c0_17] : memref<1x32xf32, #tpu.memory_space<vmem>>, vector<1x32xf32>
    %cst_18 = arith.constant dense<0.000000e+00> : vector<1x8xf32>
    %34 = tpu.matmul %33, %32, %cst_18 {dimension_numbers = #tpu.dot_dimension_numbers<[1], [1], [0], [0], [0, 0, 1, 0], [], []>, precision = #tpu.contract_precision<fp32>} : vector<1x32xf32>, vector<8x32xf32>, vector<1x8xf32> -> vector<1x8xf32>
    %c0_19 = arith.constant 0 : index
    %c0_20 = arith.constant 0 : index
    %35 = memref.load %arg5[%c0_19, %c0_20] : memref<1x1xf32, #tpu.memory_space<smem>>
    %36 = vector.broadcast %35 : f32 to vector<1x8xf32>
    %37 = arith.addf %34, %36 : vector<1x8xf32>
    %38 = math.exp %37 : vector<1x8xf32>
    %c0_21 = arith.constant 0 : index
    %c0_22 = arith.constant 0 : index
    %39 = vector.load %arg8[%c0_21, %c0_22] : memref<1x8xf32, #tpu.memory_space<vmem>>, vector<1x8xf32>
    tpu.vector_store %arg8[%c0_21, %c0_22], %38 {strides = array<i32>} : memref<1x8xf32, #tpu.memory_space<vmem>>, vector<1x8xf32>,
    return
  }
  func.func @transform_0(%arg0: i32) -> (i32, i32) {
    %c0_i32 = arith.constant 0 : i32
    %c0_i32_0 = arith.constant 0 : i32
    return %arg0, %c0_i32 : i32, i32
  }
  func.func @transform_1(%arg0: i32) -> (i32, i32) {
    %c0_i32 = arith.constant 0 : i32
    %c0_i32_0 = arith.constant 0 : i32
    %c0_i32_1 = arith.constant 0 : i32
    return %c0_i32, %c0_i32_0 : i32, i32
  }
  func.func @transform_2(%arg0: i32) -> (i32, i32) {
    %c0_i32 = arith.constant 0 : i32
    %c0_i32_0 = arith.constant 0 : i32
    %c0_i32_1 = arith.constant 0 : i32
    return %c0_i32, %c0_i32_0 : i32, i32
  }
  func.func @transform_3(%arg0: i32) -> (i32, i32) {
    %c0_i32 = arith.constant 0 : i32
    %c0_i32_0 = arith.constant 0 : i32
    %c0_i32_1 = arith.constant 0 : i32
    return %c0_i32, %c0_i32_0 : i32, i32
  }
  func.func @transform_4(%arg0: i32) -> (i32, i32) {
    %c0_i32 = arith.constant 0 : i32
    %c0_i32_0 = arith.constant 0 : i32
    %c0_i32_1 = arith.constant 0 : i32
    return %c0_i32, %c0_i32_0 : i32, i32
  }
  func.func @transform_5(%arg0: i32) -> (i32, i32) {
    %c0_i32 = arith.constant 0 : i32
    %c0_i32_0 = arith.constant 0 : i32
    %c0_i32_1 = arith.constant 0 : i32
    return %c0_i32, %c0_i32_0 : i32, i32
  }
  func.func @transform_6(%arg0: i32) -> (i32, i32) {
    %c0_i32 = arith.constant 0 : i32
    %c0_i32_0 = arith.constant 0 : i32
    %c0_i32_1 = arith.constant 0 : i32
    return %c0_i32, %c0_i32_0 : i32, i32
  }
  func.func @transform_7(%arg0: i32) -> (i32, i32) {
    %c0_i32 = arith.constant 0 : i32
    %c0_i32_0 = arith.constant 0 : i32
    return %c0_i32, %arg0 : i32, i32
  }
}

</mosaic_0001>

<bundles_post_ra>
// kernel: tpu_custom_call.1
= control target key start
LH: loop header
LB: loop body
LE: loop exit
PB: predicated region body
PF: predicated region fallthrough
CT: control target
= control target key end

     0   :  { %13 = vsyncpa [#allocation4], 0  ;;  %s1298_s0 = inlined_call_operand.hbm [shape: f32[8,8], index: 0, kind: input, shape index: {}]   ;;  %s1299_s1 = inlined_call_operand.hbm [shape: f32[8,32], index: 1, kind: input, shape index: {}]   ;;  %s1300_s2 = inlined_call_operand.vmem [shape: f32[1,32], index: 2, kind: input, shape index: {}]   ;;  %s1301_s3 = inlined_call_operand.vmem [shape: f32[1,32], index: 3, kind: input, shape index: {}]   ;;  %s1302_s4 = inlined_call_operand.<no memory space> [shape: f32[1,1], index: 4, kind: input, shape index: {}]   ;;  %s1303_s5 = inlined_call_operand.vmem [shape: f32[1,32], index: 5, kind: input, shape index: {}]   ;;  %s1304_s6 = inlined_call_operand.vmem [shape: f32[1,32], index: 6, kind: input, shape index: {}]   ;;  %s1305_s7 = inlined_call_operand.hbm [shape: f32[1,8], index: 7, kind: output, shape index: {}]  }
   0x1   :  { %14 = vsyncpa [#allocation7], 0 }
   0x2   :  { %15 = vsyncpa [#allocation5], 0  ;;  %s1189_s24 = smov [#allocation3]   ;;  %s1190_s26 = smov [#allocation6]  }
   0x3   :  { %s22_s25 = sshll.u32 %s1189_s24, 4  ;;  %s32_s27 = sshll.u32 %s1190_s26, 4  ;;  %s23_s25 = int_to_ptr.vmem [resolvable:$true] %s22_s25  ;;  %s33_s27 = int_to_ptr.vmem [resolvable:$true] %s32_s27 }
   0x4   :  { %s1131_s28 = scalar_lea.vmem %s23_s25, 128  ;;  %p1136_p1 = scmp.lt.s32.totalorder %s23_s25, %s23_s25 }
   0x5   :  { %p1132_p0 = scmp.ne.s32.totalorder %s23_s25, %s1131_s28  ;;  %p1137_p2 = scmp.lt.s32.totalorder %s1131_s28, %s1131_s28 }
   0x7   :  { %p1138_p3 = por %p1137_p2, %p1136_p1 }
   0x9   :  { %p1139_p4 = pnand %p1138_p3, %p1132_p0 }
   0xb   :  { %1142 = shalt.err (!%p1139_p4)
}
   0xc   :  { %25 = dma.hbm_to_vmem [thread:$0]  %s1298_s0, 128, %s23_s25, [#allocation4]  }
   0xd   :  { %s1151_s8 = scalar_lea.vmem %s33_s27, 128  ;;  %p1156_p6 = scmp.lt.s32.totalorder %s33_s27, %s33_s27 }
   0xe   :  { %p1152_p5 = scmp.ne.s32.totalorder %s33_s27, %s1151_s8  ;;  %p1157_p7 = scmp.lt.s32.totalorder %s1151_s8, %s1151_s8 }
  0x10   :  { %p1158_p8 = por %p1157_p7, %p1156_p6 }
  0x12   :  { %p1159_p9 = pnand %p1158_p8, %p1152_p5 }
  0x14   :  { %1162 = shalt.err (!%p1159_p9)
}
  0x15   :  { %35 = dma.hbm_to_vmem [thread:$0]  %s1299_s1, 128, %s33_s27, [#allocation7]  }
  0x16   :  { %1183 = dma.done.wait [#allocation4], 128  }
  0x17   :  { %1184 = vsyncadd [#allocation4], 4294967168 }
  0x18   :  { %1185 = dma.done.wait [#allocation7], 128  }
  0x19   :  { %1186 = vsyncadd [#allocation7], 4294967168  ;;  %v1191_v0 = vmov 0.0   ;;  %vm1192_vm0 = vmmov 0   ;;  %vm61_vm1 = vcmask 64512   ;;  %v53_v1 = vld [vmem:[#allocation6] sm:$0xff]  ;;  %v541_v55 = vlaneseq }
  0x1a   :  { %1054 = vmatprep.subr.mxu0 %v1191_v0  ;;  %1059 = vmatprep.subr.mxu1 %v1191_v0  ;;  %v52_v2 = vld [vmem:[#allocation3] sm:$0xff]  ;;  %v96_v3 = vand.u32 4294901760, %v53_v1  ;;  %vm512_vm2 = vcmask 261120   ;;  %vm1011_vm3 = vcmask 57344  }
  0x1b   :  { %1056 = vmatprep.mubr.msk.f32.mxu0 %vm1192_vm0, %v1191_v0  ;;  %1061 = vmatprep.mubr.msk.f32.mxu1 %vm1192_vm0, %v1191_v0  ;;  %v63_v4 = vsel %vm61_vm1, %v52_v2, 0  ;;  %v1029_v14 = vld [vmem:[%s1300_s2] ss:$0 sm:$0xff]  ;;  %v542_v58 = vshrl.u32 %v541_v55, 7 }
  0x1c   :  { %v131_v5 = vand.u32 4294901760, %v63_v4  ;;  %1055 = vmatpush3.msra.mxu0 %v96_v3  ;;  %v173_v6 = vsub.f32 %v53_v1, %v96_v3  ;;  %v554_v56 = vld [vmem:[%s1301_s3] sm:$0x1] }
  0x1d   :  { %1064 = vmatprep.subr.mxu0 %v1191_v0  ;;  %v558_v57 = vsel %vm512_vm2, %v554_v56, 0  ;;  %v533_v60 = vld [vmem:[%s1303_s5] sm:$0x1]  ;;  %v543_v61 = vsub.s32 0, %v542_v58 }
  0x1e   :  { %v132_v7 = vsub.f32 %v63_v4, %v131_v5  ;;  %v174_v8 = vand.u32 4294901760, %v173_v6  ;;  %v629_v59 = vand.u32 4294901760, %v558_v57  ;;  %v537_v2 = vld [vmem:[%s1304_s6] sm:$0x1] }
  0x20   :  { %v133_v9 = vand.u32 4294901760, %v132_v7  ;;  %v175_v10 = vsub.f32 %v173_v6, %v174_v8  ;;  %v630_v1 = vsub.f32 %v558_v57, %v629_v59 }
  0x22   :  { %v134_v11 = vsub.f32 %v132_v7, %v133_v9  ;;  %v176_v12 = vand.u32 4294901760, %v175_v10 }
  0x24   :  { %v135_v13 = vand.u32 4294901760, %v134_v11  ;;  %1060 = vmatpush3.msra.mxu1 %v176_v12 }
  0x25   :  { %1062 = vmatmul.mubr.f32.vlgmr.msra.gmra.mxu1 %v131_v5  ;;  %1069 = vmatprep.subr.mxu1 %v1191_v0 }
  0x26   :  { %1057 = vmatmul.mubr.f32.vlgmr.msra.gmra.mxu0 %v135_v13  ;;  %1070 = vmatpush3.msra.mxu1 %v96_v3 }
  0x27   :  { %1065 = vmatpush3.msra.mxu0 %v173_v6  ;;  %1066 = vmatprep.mubr.msk.f32.mxu0 %vm1192_vm0, %v1191_v0  ;;  %v631_v6 = vand.u32 4294901760, %v630_v1 }
  0x28   :  { %1071 = vmatprep.mubr.msk.f32.mxu1 %vm1192_vm0, %v1191_v0  ;;  %1074 = vmatprep.subr.mxu0 %v1191_v0 }
  0x29   :  { %1072 = vmatmul.mubr.f32.vlgmr.msra.gmra.mxu1 %v133_v9  ;;  %1079 = vmatprep.subr.mxu1 %v1191_v0  ;;  %v632_v10 = vsub.f32 %v630_v1, %v631_v6 }
  0x2a   :  { %1067 = vmatmul.mubr.f32.vlgmr.msra.gmra.mxu0 %v132_v7  ;;  %1080 = vmatpush3.msra.mxu1 %v96_v3 }
  0x2b   :  { %1075 = vmatpush3.msra.mxu0 %v174_v8  ;;  %1076 = vmatprep.mubr.msk.f32.mxu0 %vm1192_vm0, %v1191_v0  ;;  %v633_v13 = vand.u32 4294901760, %v632_v10 }
  0x2c   :  { %1081 = vmatprep.mubr.msk.f32.mxu1 %vm1192_vm0, %v1191_v0  ;;  %1084 = vmatprep.subr.mxu0 %v1191_v0 }
  0x2d   :  { %1082 = vmatmul.mubr.f32.vlgmr.msra.gmra.mxu1 %v131_v5  ;;  %1089 = vmatprep.subr.mxu1 %v1191_v0 }
  0x2e   :  { %1077 = vmatmul.mubr.f32.vlgmr.msra.gmra.mxu0 %v131_v5  ;;  %1091 = vmatprep.mubr.msk.f32.mxu1 %vm1192_vm0, %v1191_v0 }
  0x2f   :  { %1086 = vmatprep.mubr.msk.f32.mxu0 %vm1192_vm0, %v1191_v0 }
  0xe5   :  { %v213_v16 = vpop.f32.mrf.mxu1 }
  0xe6   :  { %v137_v15 = vpop.f32.mrf.mxu0 }
  0xe7   :  { %v138_v17 = vadd.f32 %v1029_v14, %v137_v15  ;;  %v1063_v19 = vpop.f32.mrf.mxu1 }
  0xe8   :  { %v1058_v18 = vpop.f32.mrf.mxu0  ;;  %v556_v19 = vstv %s1302_s4  ;;  %s1193_s4 = smov [#allocation8]  }
  0xe9   :  { %v214_v20 = vadd.f32 %v213_v16, %v138_v17  ;;  %v361_v22 = vpop.f32.mrf.mxu1  ;;  %s1019_s6 = sshll.u32 %s1193_s4, 4  ;;  %s1020_s6 = int_to_ptr.vmem [resolvable:$true] %s1019_s6 }
  0xea   :  { %v287_v21 = vpop.f32.mrf.mxu0  ;;  %s1163_s16 = scalar_lea.vmem %s1020_s6, 16  ;;  %s1167_s17 = scalar_lea.vmem %s1020_s6, 32 }
  0xeb   :  { %v288_v23 = vadd.f32 %v287_v21, %v214_v20  ;;  %v1073_v25 = vpop.f32.mrf.mxu1  ;;  %p1164_p10 = scmp.ne.s32.totalorder %s1020_s6, %s1163_s16  ;;  %p1168_p11 = scmp.lt.s32.totalorder %s1020_s6, %s1020_s6 }
  0xec   :  { %v1068_v24 = vpop.f32.mrf.mxu0  ;;  %p1169_p12 = scmp.lt.s32.totalorder %s1167_s17, %s1163_s16 }
  0xed   :  { %v362_v26 = vadd.f32 %v361_v22, %v288_v23  ;;  %v507_v28 = vpop.f32.mrf.mxu1 }
  0xee   :  { %v435_v27 = vpop.f32.mrf.mxu0  ;;  %p1170_p13 = por %p1169_p12, %p1168_p11 }
  0xef   :  { %v436_v29 = vadd.f32 %v435_v27, %v362_v26  ;;  %v1083_v31 = vpop.f32.mrf.mxu1 }
  0xf0   :  { %v1078_v30 = vpop.f32.mrf.mxu0  ;;  %p1171_p0 = pnand %p1170_p13, %p1164_p10 }
  0xf1   :  { %v508_v32 = vadd.f32 %v507_v28, %v436_v29 }
  0xf3   :  { %v511_v33 = vmax.f32 %v508_v32, 0.0 }
  0xf5   :  { %v513_v34 = vsel %vm512_vm2, %v511_v33, 0.0  ;;  %v521_v35 = vmul.f32 %v511_v33, %v511_v33 }
  0xf6   :  { %v514_v36 = vrot.slane %v513_v34, 4 }
  0xf7   :  { %v522_v37 = vsel %vm512_vm2, %v521_v35, 0.0 }
  0xf8   :  { %v515_v38 = vadd.f32 %v514_v36, %v513_v34  ;;  %v523_v39 = vrot.slane %v522_v37, 4 }
  0xfa   :  { %v516_v40 = vrot.slane %v515_v38, 2  ;;  %v524_v41 = vadd.f32 %v523_v39, %v522_v37 }
  0xfc   :  { %v517_v42 = vadd.f32 %v516_v40, %v515_v38  ;;  %v525_v43 = vrot.slane %v524_v41, 2 }
  0xfe   :  { %v518_v44 = vrot.slane %v517_v42, 1  ;;  %v526_v45 = vadd.f32 %v525_v43, %v524_v41 }
 0x100   :  { %v519_v46 = vadd.f32 %v518_v44, %v517_v42  ;;  %v527_v47 = vrot.slane %v526_v45, 1 }
 0x102   :  { %v520_v48 = vmul.f32 0.125, %v519_v46  ;;  %v528_v49 = vadd.f32 %v527_v47, %v526_v45 }
 0x104   :  { %v529_v50 = vmul.f32 0.125, %v528_v49  ;;  %v530_v51 = vmul.f32 %v520_v48, %v520_v48 }
 0x106   :  { %v531_v52 = vsub.f32 %v529_v50, %v530_v51 }
 0x108   :  { %v532_v53 = vmax.f32 %v531_v52, 0.0 }
 0x10a   :  { %v534_v54 = vadd.f32 1e-05, %v532_v53 }
 0x10c   :  { %1119 = vrsqrt.f32 %v534_v54 }
 0x119   :  { %v1120_v62 = vpop.eup %1119 }
 0x11a   :  { %v536_v63 = vmul.f32 %v1120_v62, %v533_v60 }
 0x11c   :  { %v538_v3 = vmul.f32 %v536_v63, %v520_v48  ;;  %v544_v4 = vrot.slane %v536_v63, %v543_v61 }
 0x11e   :  { %v539_v5 = vsub.f32 %v537_v2, %v538_v3  ;;  %v546_v7 = vmul.f32 %v544_v4, %v511_v33 }
 0x120   :  { %v551_v8 = vrot.slane %v539_v5, %v543_v61 }
 0x122   :  { %v553_v9 = vadd.f32 %v551_v8, %v546_v7 }
 0x124   :  { %v561_v11 = vsel %vm512_vm2, %v553_v9, 0 }
 0x125   :  { %v594_v12 = vand.u32 4294901760, %v561_v11 }
 0x127   :  { %1085 = vmatpush3.xpose.msra.mxu0 %v594_v12  ;;  %v671_v14 = vsub.f32 %v561_v11, %v594_v12 }
 0x128   :  { %1094 = vmatprep.subr.mxu0 %v1191_v0 }
 0x129   :  { %v672_v15 = vand.u32 4294901760, %v671_v14 }
 0x12a   :  { %1087 = vmatmul.mubr.f32.vlgmr.msra.gmra.mxu0 %v633_v13 }
 0x12b   :  { %1095 = vmatpush3.xpose.msra.mxu0 %v671_v14  ;;  %1096 = vmatprep.mubr.msk.f32.mxu0 %vm1192_vm0, %v1191_v0  ;;  %v673_v16 = vsub.f32 %v671_v14, %v672_v15 }
 0x12c   :  { %1104 = vmatprep.subr.mxu0 %v1191_v0 }
 0x12d   :  { %v674_v17 = vand.u32 4294901760, %v673_v16 }
 0x12e   :  { %1097 = vmatmul.mubr.f32.vlgmr.msra.gmra.mxu0 %v630_v1 }
 0x12f   :  { %1090 = vmatpush3.xpose.msra.mxu1 %v674_v17  ;;  %1105 = vmatpush3.xpose.msra.mxu0 %v672_v15 }
 0x130   :  { %1099 = vmatprep.subr.mxu1 %v1191_v0  ;;  %1106 = vmatprep.mubr.msk.f32.mxu0 %vm1192_vm0, %v1191_v0 }
 0x132   :  { %1092 = vmatmul.mubr.f32.vlgmr.msra.gmra.mxu1 %v629_v59  ;;  %1107 = vmatmul.mubr.f32.vlgmr.msra.gmra.mxu0 %v629_v59 }
 0x133   :  { %1100 = vmatpush3.xpose.msra.mxu1 %v594_v12  ;;  %1101 = vmatprep.mubr.msk.f32.mxu1 %vm1192_vm0, %v1191_v0 }
 0x134   :  { %1109 = vmatprep.subr.mxu1 %v1191_v0 }
 0x136   :  { %1102 = vmatmul.mubr.f32.vlgmr.msra.gmra.mxu1 %v631_v6 }
 0x137   :  { %1110 = vmatpush3.xpose.msra.mxu1 %v594_v12  ;;  %1111 = vmatprep.mubr.msk.f32.mxu1 %vm1192_vm0, %v1191_v0 }
 0x13a   :  { %1112 = vmatmul.mubr.f32.vlgmr.msra.gmra.mxu1 %v629_v59 }
 0x1ea   :  { %v635_v18 = vpop.f32.mrf.mxu0 }
 0x1eb   :  { %v636_v22 = vadd.f32 %v635_v18, %v556_v19 }
 0x1ec   :  { %v1088_v20 = vpop.f32.mrf.mxu0 }
 0x1ee   :  { %v785_v21 = vpop.f32.mrf.mxu0 }
 0x1f0   :  { %v1098_v23 = vpop.f32.mrf.mxu0 }
 0x1f2   :  { %v711_v24 = vpop.f32.mrf.mxu1  ;;  %v933_v25 = vpop.f32.mrf.mxu0 }
 0x1f3   :  { %v712_v26 = vadd.f32 %v711_v24, %v636_v22 }
 0x1f4   :  { %v1093_v27 = vpop.f32.mrf.mxu1  ;;  %v1108_v28 = vpop.f32.mrf.mxu0 }
 0x1f5   :  { %v786_v29 = vadd.f32 %v785_v21, %v712_v26 }
 0x1f6   :  { %v859_v30 = vpop.f32.mrf.mxu1 }
 0x1f7   :  { %v860_v31 = vadd.f32 %v859_v30, %v786_v29 }
 0x1f8   :  { %v1103_v32 = vpop.f32.mrf.mxu1 }
 0x1f9   :  { %v934_v0 = vadd.f32 %v933_v25, %v860_v31 }
 0x1fa   :  { %v1005_v33 = vpop.f32.mrf.mxu1 }
 0x1fb   :  { %v1006_v34 = vadd.f32 %v1005_v33, %v934_v0 }
 0x1fc   :  { %v1113_v35 = vpop.f32.mrf.mxu1 }
 0x1fd   :  { %v1009_v36 = vmul.f32 1.442695, %v1006_v34 }
 0x1ff   :  { %1121 = vpow2.f32 %v1009_v36 }
 0x20c   :  { %v1122_v37 = vpop.eup %1121 }
 0x20d   :  { %1012 = vst.msk [vmem:[#allocation8] sm:$0x1] %vm1011_vm3, %v1122_v37 }
 0x20e   :  { %1174 = shalt.err (!%p1171_p0)
}
 0x20f   :  { %1022 = dma.vmem_to_hbm [thread:$0]  %s1020_s6, 16, %s1305_s7, [#allocation5]  }
 0x210   :  { %1187 = dma.done.wait [#allocation5], 16  }
 0x211   :  { %1188 = vsyncadd [#allocation5], 4294967280 }
 0x212   :  { %1026 = vsyncpa [#allocation4], 1 }
 0x213   :  { %1027 = vsyncpa [#allocation7], 1 }
 0x214   :  { %1028 = vsyncpa [#allocation5], 1 }

</bundles_post_ra>
